<compile_context>
chip_gen: v5e
topology: v5e:2x2
jax: 0.10.0
libtpu: 0.0.40
codegen_flags: <defaults>
</compile_context>

<pallas_src>
import functools
import math

import jax
import jax.numpy as jnp
from jax.experimental import pallas as pl
from jax.experimental.pallas import tpu as pltpu


def _round_up(n, m):
    return ((n + m - 1) // m) * m


def _vmem_limit_bytes():
    """Generation-aware VMEM cap: ~85% of physical, never more than 100 MiB."""
    try:
        phys = int(pltpu.get_tpu_info().vmem_capacity_bytes)
    except Exception:
        phys = 64 * 1024 * 1024  # conservative (v7x-sized) fallback
    return min(int(phys * 0.85), 100 * 1024 * 1024)


# --------------------------------------------------------------------------- #
# Kernels
# --------------------------------------------------------------------------- #
def _matmul_bias_kernel(x_ref, w_ref, b_ref, o_ref):
    """One (row-block, vocab-block, K-block) grid step.

    x_ref: (tm, tk) bf16 activations
    w_ref: (tk, tn) bf16 weight tile (pre-transposed, lane-dense over vocab)
    b_ref: (1,  tn) f32 bias tile
    o_ref: (tm, tn) f32 logits block -- resident across K, doubles as the
           accumulator (initialized with the bias, so no epilogue add).
    """
    k = pl.program_id(2)

    @pl.when(k == 0)
    def _init():
        o_ref[...] = jnp.broadcast_to(b_ref[...], o_ref.shape)

    o_ref[...] += jnp.dot(x_ref[...], w_ref[...],
                          preferred_element_type=jnp.float32)


def _abs_softmax_kernel(vocab, logits_ref, o_ref):
    """Rowwise abs-softmax over the (padded) vocab for one row block.

    Padded vocab lanes hold exact zeros (zero-padded weights/bias), so the row
    max of |logits| is unaffected by them; only the sum needs the lane mask.
    """
    x = logits_ref[...]                                   # (tm, vpad) f32
    a = jnp.abs(x)
    m = jnp.max(a, axis=-1, keepdims=True)                # cancels in the ratio
    e = jnp.exp(a - m)
    col = jax.lax.broadcasted_iota(jnp.int32, x.shape, dimension=1)
    e = jnp.where(col < vocab, e, 0.0)                    # mask padded lanes
    s = jnp.sum(e, axis=-1, keepdims=True)
    inv = pl.reciprocal(s, approx=False)                  # per-row -> cheap
    # sign(0) == 0 -> padded lanes / zero logits emit 0, matching torch.sign.
    o_ref[...] = (jnp.sign(x) * e * inv).astype(o_ref.dtype)


# --------------------------------------------------------------------------- #
# Host-side module
# --------------------------------------------------------------------------- #
def conditional_flatten(x):
    if x.ndim == 3:
        return x.reshape(x.shape[0], -1)
    elif x.ndim == 2:
        return x.reshape(1, -1)   # torch flatten(start_dim=0) -> 1D; keep a row
    else:
        raise ValueError(f"Expected 2D or 3D input, got shape {x.shape}")


def prepare_generator_params(weight, bias, *, tn=2048, tk=512):
    """One-time parameter prep (outside the forward path).

    weight: (vocab, d_flatten) as in nn.Linear; bias: (vocab,).
    Returns a dict with the padded bf16 (dpad, vpad) weight, padded f32 bias,
    true sizes and the chosen (tn, tk) tile sizes.
    """
    vocab, d_flatten = weight.shape

    # K tiling: multiple of 256 (full MXU K on v6e/v7x), capped by d_flatten.
    dpad = _round_up(d_flatten, 256)
    tk = _round_up(min(tk, dpad), 256)
    dpad = _round_up(dpad, tk)

    # Vocab tiling: lane-dense 128-multiples; padded lanes masked in pass 2.
    vpad = _round_up(vocab, 128)
    tn = _round_up(min(tn, vpad), 128)
    vpad = _round_up(vpad, tn)

    w_t = jnp.pad(weight.T.astype(jnp.bfloat16),
                  ((0, dpad - d_flatten), (0, vpad - vocab)))   # transpose ONCE
    b2 = jnp.pad(bias.astype(jnp.float32), (0, vpad - vocab)).reshape(1, vpad)
    return {"w_t": w_t, "b2": b2, "vocab": vocab, "d_flatten": d_flatten,
            "tn": tn, "tk": tk}


def _softmax_row_tile(bpad, vpad, vmem_limit):
    """Row-block size for pass 2 so in+out (double-buffered) fit comfortably."""
    budget = vmem_limit // 4
    tm = min(bpad, 256)
    while tm > 16 and 4 * tm * vpad * 4 > budget:
        tm //= 2
    tm = max(16, min(tm, bpad))
    while bpad % tm != 0:
        tm //= 2
    return max(tm, 8)


def generator_forward(x, params, *, tm=128):
    w_t, b2 = params["w_t"], params["b2"]
    vocab, d_flatten = params["vocab"], params["d_flatten"]
    tn, tk = params["tn"], params["tk"]
    dpad, vpad = w_t.shape

    was_2d = (x.ndim == 2)
    xf = conditional_flatten(x)
    B = xf.shape[0]
    assert xf.shape[1] == d_flatten

    # Pad rows to a multiple of 16 (bf16 sublane pack); zero rows discarded.
    bpad = _round_up(B, 16)
    tm = _round_up(min(tm, bpad), 16)
    bpad = _round_up(bpad, tm)

    xp = jnp.pad(xf.astype(jnp.bfloat16),
                 ((0, bpad - B), (0, dpad - d_flatten)))

    vmem_limit = _vmem_limit_bytes()

    # ---- Pass 1: logits = flatten(x) @ W^T + b, tiled rows x vocab x K ----
    cost1 = pl.CostEstimate(
        flops=2 * bpad * dpad * vpad,
        transcendentals=0,
        bytes_accessed=(bpad * dpad * 2 + dpad * vpad * 2
                        + vpad * 4 + bpad * vpad * 4),
    )
    logits = pl.pallas_call(
        _matmul_bias_kernel,
        out_shape=jax.ShapeDtypeStruct((bpad, vpad), jnp.float32),
        grid=(bpad // tm, vpad // tn, dpad // tk),
        in_specs=[
            pl.BlockSpec((tm, tk), lambda i, j, k: (i, k)),   # activations
            pl.BlockSpec((tk, tn), lambda i, j, k: (k, j)),   # streamed weight
            pl.BlockSpec((1, tn), lambda i, j, k: (0, j)),    # bias tile
        ],
        out_specs=pl.BlockSpec((tm, tn), lambda i, j, k: (i, j)),
        compiler_params=pltpu.CompilerParams(
            dimension_semantics=("parallel", "parallel", "arbitrary"),
            vmem_limit_bytes=vmem_limit,
        ),
        cost_estimate=cost1,
    )(xp, w_t, b2)

    # ---- Pass 2: rowwise abs-softmax (padded lanes masked out of the sum) ----
    tm_sm = _softmax_row_tile(bpad, vpad, vmem_limit)
    cost2 = pl.CostEstimate(
        flops=4 * bpad * vpad,
        transcendentals=bpad * vpad,
        bytes_accessed=2 * bpad * vpad * 4,
    )
    out = pl.pallas_call(
        functools.partial(_abs_softmax_kernel, vocab),
        out_shape=jax.ShapeDtypeStruct((bpad, vpad), jnp.float32),
        grid=(bpad // tm_sm,),
        in_specs=[pl.BlockSpec((tm_sm, vpad), lambda i: (i, 0))],
        out_specs=pl.BlockSpec((tm_sm, vpad), lambda i: (i, 0)),
        compiler_params=pltpu.CompilerParams(
            dimension_semantics=("parallel",),
            vmem_limit_bytes=vmem_limit,
        ),
        cost_estimate=cost2,
    )(logits)

    out = out[:B, :vocab]
    if was_2d:
        out = out.reshape(vocab)                # 2D torch input -> 1D output
    return out


def abs_softmax_ref(x):
    e = jnp.exp(jnp.abs(x))
    return jnp.sign(x) * e / jnp.sum(e, axis=-1, keepdims=True)


if __name__ == "__main__":
    B, S, D = 2, 8, 64            # batch=2, seq=8, hidden=64
    d_flatten = S * D             # 512
    vocab = 200                   # not a 128-multiple -> exercises lane masking

    key = jax.random.PRNGKey(0)
    kx, kw, kb = jax.random.split(key, 3)

    x = jax.random.normal(kx, (B, S, D), dtype=jnp.float32)
    # Deterministic nn.Linear-style init (uniform in +/- 1/sqrt(fan_in)).
    bound = 1.0 / math.sqrt(d_flatten)
    weight = jax.random.uniform(kw, (vocab, d_flatten), jnp.float32, -bound, bound)
    bias = jax.random.uniform(kb, (vocab,), jnp.float32, -bound, bound)

    # Parameter prep happens once, outside the forward.  Small tiles are chosen
    # only so the toy shapes exercise the K accumulation (2 steps, tk=256) and
    # the vocab grid axis (2 tiles, tn=128); defaults are tk=512 / tn=2048.
    params = prepare_generator_params(weight, bias, tn=128, tk=256)

    out = generator_forward(x, params)
    out = jax.block_until_ready(out)
    assert out.shape == (B, vocab)

    # Reference with the same bf16 weight/activation quantization, f32 math.
    xq = x.reshape(B, d_flatten).astype(jnp.bfloat16).astype(jnp.float32)
    wq = weight.astype(jnp.bfloat16).astype(jnp.float32)
    logits_ref = jnp.dot(xq, wq.T, precision=jax.lax.Precision.HIGHEST) + bias
    ref = abs_softmax_ref(logits_ref)
    assert jnp.allclose(out, ref, atol=1e-4, rtol=1e-2)

    # 2D path: torch flatten(start_dim=0) -> 1D logits of size vocab.
    x2d = x[0].reshape(S, D)
    out2 = jax.block_until_ready(generator_forward(x2d, params))
    assert out2.shape == (vocab,)
    ref2 = abs_softmax_ref(logits_ref[0])
    assert jnp.allclose(out2, ref2, atol=1e-4, rtol=1e-2)

    print("KERNEL_OK")
</pallas_src>

<mosaic_0001>
module attributes {stable_mosaic.version = 11 : i64} {
  func.func @_matmul_bias_kernel(%arg0: i32, %arg1: i32, %arg2: i32, %arg3: memref<16x256xbf16, #tpu.memory_space<vmem>>, %arg4: memref<256x128xbf16, #tpu.memory_space<vmem>>, %arg5: memref<1x128xf32, #tpu.memory_space<vmem>>, %arg6: memref<16x128xf32, #tpu.memory_space<vmem>>) attributes {dimension_semantics = [#tpu.dimension_semantics<parallel>, #tpu.dimension_semantics<parallel>, #tpu.dimension_semantics<arbitrary>], iteration_bounds = array<i64: 1, 2, 2>, scalar_prefetch = 0 : i64, scratch_operands = 0 : i64, tpu.core_type = #tpu.core_type<tc>, window_params = [{transform_indices = @transform_0, window_bounds = array<i64: 16, 256>}, {transform_indices = @transform_1, window_bounds = array<i64: 256, 128>}, {transform_indices = @transform_2, window_bounds = array<i64: 1, 128>}, {transform_indices = @transform_3, window_bounds = array<i64: 16, 128>}]} {
    %c0_i32 = arith.constant 0 : i32
    %0 = arith.cmpi eq, %arg2, %c0_i32 : i32
    %1 = arith.extui %0 : i1 to i32
    %c0_i32_0 = arith.constant 0 : i32
    %2 = arith.cmpi ne, %1, %c0_i32_0 : i32
    scf.if %2 {
      %c0_8 = arith.constant 0 : index
      %c0_9 = arith.constant 0 : index
      %9 = vector.load %arg5[%c0_8, %c0_9] : memref<1x128xf32, #tpu.memory_space<vmem>>, vector<1x128xf32>
      %10 = vector.shape_cast %9 : vector<1x128xf32> to vector<1x128xf32>
      %11 = vector.broadcast %10 : vector<1x128xf32> to vector<16x128xf32>
      %c0_10 = arith.constant 0 : index
      %c0_11 = arith.constant 0 : index
      %12 = vector.load %arg6[%c0_10, %c0_11] : memref<16x128xf32, #tpu.memory_space<vmem>>, vector<16x128xf32>
      tpu.vector_store %arg6[%c0_10, %c0_11], %11 {strides = array<i32>} : memref<16x128xf32, #tpu.memory_space<vmem>>, vector<16x128xf32>,
    } else {
    }
    %c0 = arith.constant 0 : index
    %c0_1 = arith.constant 0 : index
    %3 = vector.load %arg6[%c0, %c0_1] : memref<16x128xf32, #tpu.memory_space<vmem>>, vector<16x128xf32>
    %c0_2 = arith.constant 0 : index
    %c0_3 = arith.constant 0 : index
    %4 = vector.load %arg3[%c0_2, %c0_3] : memref<16x256xbf16, #tpu.memory_space<vmem>>, vector<16x256xbf16>
    %c0_4 = arith.constant 0 : index
    %c0_5 = arith.constant 0 : index
    %5 = vector.load %arg4[%c0_4, %c0_5] : memref<256x128xbf16, #tpu.memory_space<vmem>>, vector<256x128xbf16>
    %cst = arith.constant dense<0.000000e+00> : vector<16x128xf32>
    %6 = tpu.matmul %4, %5, %cst {dimension_numbers = #tpu.dot_dimension_numbers<[1], [0], [0], [1], [0, 0, 1, 1], [], []>} : vector<16x256xbf16>, vector<256x128xbf16>, vector<16x128xf32> -> vector<16x128xf32>
    %7 = arith.addf %3, %6 : vector<16x128xf32>
    %c0_6 = arith.constant 0 : index
    %c0_7 = arith.constant 0 : index
    %8 = vector.load %arg6[%c0_6, %c0_7] : memref<16x128xf32, #tpu.memory_space<vmem>>, vector<16x128xf32>
    tpu.vector_store %arg6[%c0_6, %c0_7], %7 {strides = array<i32>} : memref<16x128xf32, #tpu.memory_space<vmem>>, vector<16x128xf32>,
    return
  }
  func.func @transform_0(%arg0: i32, %arg1: i32, %arg2: i32) -> (i32, i32) {
    %c0_i32 = arith.constant 0 : i32
    return %arg0, %arg2 : i32, i32
  }
  func.func @transform_1(%arg0: i32, %arg1: i32, %arg2: i32) -> (i32, i32) {
    %c0_i32 = arith.constant 0 : i32
    return %arg2, %arg1 : i32, i32
  }
  func.func @transform_2(%arg0: i32, %arg1: i32, %arg2: i32) -> (i32, i32) {
    %c0_i32 = arith.constant 0 : i32
    %c0_i32_0 = arith.constant 0 : i32
    return %c0_i32, %arg1 : i32, i32
  }
  func.func @transform_3(%arg0: i32, %arg1: i32, %arg2: i32) -> (i32, i32) {
    %c0_i32 = arith.constant 0 : i32
    return %arg0, %arg1 : i32, i32
  }
}

</mosaic_0001>

<bundles_post_ra>
// kernel: tpu_custom_call.1
= control target key start
LH: loop header
LB: loop body
LE: loop exit
PB: predicated region body
PF: predicated region fallthrough
CT: control target
= control target key end

     0   :  { %s1504_s0 = inlined_call_operand.hbm [shape: bf16[16,512], index: 0, kind: input, shape index: {}]   ;;  %s1505_s1 = inlined_call_operand.hbm [shape: bf16[512,256], index: 1, kind: input, shape index: {}]   ;;  %s1506_s2 = inlined_call_operand.hbm [shape: f32[1,256], index: 2, kind: input, shape index: {}]   ;;  %s1507_s3 = inlined_call_operand.hbm [shape: f32[16,256], index: 3, kind: output, shape index: {}]  }
   0x1   :  { %1516 = sst [smem:[#allocation19_spill]] %s1504_s0 }
   0x2   :  { %1517 = sst [smem:[#allocation20_spill]] %s1505_s1 }
   0x3   :  { %1518 = sst [smem:[#allocation21_spill]] %s1507_s3 }
   0x4   :  { %8 = vsyncpa [#allocation3], 0 }
   0x5   :  { %10 = vsyncpa [#allocation3 + $0x1], 0 }
   0x6   :  { %11 = vsyncpa [#allocation6], 0 }
   0x7   :  { %13 = vsyncpa [#allocation6 + $0x1], 0 }
   0x8   :  { %14 = vsyncpa [#allocation4], 0 }
   0x9   :  { %16 = vsyncpa [#allocation4 + $0x1], 0  ;;  %s1165_s12 = smov 0   ;;  %s1167_s13 = smov 0  }
   0xa   :  { %s1169_s14 = smov 0   ;;  %s1171_s15 = smov 0  }
   0xb   :  { %s1173_s16 = smov 0   ;;  %s1175_s17 = smov 0  }
   0xc   :  { %s1177_s18 = smov 0   ;;  %s1179_s19 = smov 0  }
   0xd   :  { %s1181_s20 = smov 0   ;;  %s1183_s21 = smov 0  }
   0xe   :  { %s1185_s22 = smov 0   ;;  %s1187_s23 = smov 0  }
   0xf   :  { %s1189_s24 = smov 0   ;;  %s1191_s25 = smov 0  }
  0x10 LB: > { %1519 = sst [smem:[#allocation13_spill]] %s1115_s20  ;;  %s34_s26 = sadd.s32 1, %s1127_s23  ;;  %s1135_s25 = sphi %s1191_s25, %s22_s25   ;;  %s1131_s24 = sphi %s1189_s24, %s1557_s24   ;;  %s1127_s23 = sphi %s1187_s23, %s1545_s23   ;;  %s1123_s22 = sphi %s1185_s22, %s1556_s22   ;;  %s1119_s21 = sphi %s1183_s21, %s1544_s21   ;;  %s1115_s20 = sphi %s1181_s20, %s1543_s20   ;;  %s1111_s19 = sphi %s1179_s19, %s1555_s19   ;;  %s1107_s18 = sphi %s1177_s18, %s1554_s18   ;;  %s1103_s17 = sphi %s1175_s17, %s1553_s17   ;;  %s1099_s16 = sphi %s1173_s16, %s1552_s16   ;;  %s1095_s15 = sphi %s1171_s15, %s1551_s15   ;;  %s1091_s14 = sphi %s1169_s14, %s1550_s14   ;;  %s1087_s13 = sphi %s1167_s13, %s1549_s13   ;;  %s1083_s12 = sphi %s1165_s12, %s1548_s12  }
  0x11   : > { %1520 = sst [smem:[#allocation14_spill]] %s1127_s23  ;;  %p1237_p0 = scmp.ge.s32.totalorder %s34_s26, 2 }
  0x12   : > { %p58_p1 = scmp.eq.s32.totalorder %s1135_s25, 0  ;;  %p85_p2 = scmp.ne.s32.totalorder %s1103_s17, %s1099_s16 }
  0x13   : > { %s1559_s26 = smov (%p1237_p0, %s34_s26), 0  ;;  %p91_p4 = scmp.ne.s32.totalorder %s1099_s16, %s1095_s15 }
  0x14   : > { %1522 = sst [smem:[#allocation15_spill]] %s1559_s26  ;;  %p1251_p3 = por %p85_p2, %p58_p1 }
  0x15   : > { %s1259_s4 = ssub.s32 %s1127_s23, %s1559_s26  ;;  %p768_p6 = scmp.lt.s32.totalorder %s1135_s25, 4 }
  0x16   : > { %p48_p5 = scmp.eq.s32.totalorder %s1259_s4, 0  ;;  %s194_s5 = sand.u32 1, %s1135_s25  }
  0x17   : > { %s196_s6 = sand.u32 1, %s1103_s17   ;;  %s727_s8 = sshll.u32 %s1127_s23, 6 }
  0x18   : > { %s641_s7 = sshll.u32 %s196_s6, 7  ;;  %s203_s9 = sadd.s32 %s1131_s24, %s727_s8 }
  0x19   : > { %s644_s10 = sshll.u32 %s203_s9, 2  ;;  %s198_s11 = scalar_lea.vmem [#allocation5], %s641_s7 }
  0x1a   : > { %s208_s29 = sshll.u32 %s198_s11, 4  ;;  %s1524_s1 = sld [smem:[#allocation20_spill]]  ;;  %s209_s29 = int_to_ptr.vmem [resolvable:$true] %s208_s29 }
  0x1b   : > { %p758_p7 = pnand %p768_p6, %p1251_p3  ;;  %s1274_s7 = scalar_lea.sflag [#allocation6], %s194_s5 }
  0x1c   : > { %s1510_s8 = smov 128   ;;  %s1138_s9 = smov 64  }
  0x1d   : > { %s1139_s3 = smov 4   ;;  %p645_p8 = scmp.ge.s32.totalorder %s1135_s25, 1 }
  0x1e   : > { %p233_p9 = scmp.lt.s32.totalorder %s1135_s25, 5  ;;  %p57_p11 = scmp.ne.s32.totalorder %s1115_s20, %s1111_s19 }
  0x1f   : > { %p63_p12 = scmp.ne.s32.totalorder %s1111_s19, %s1107_s18  ;;  %s169_s5 = sand.u32 1, %s1115_s20  }
  0x20   : > { %s205_s26 = scalar_lea.hbm %s1524_s1, %s644_s10  ;;  %p1280_p10 = pnand %p645_p8, %p233_p9 }
  0x21   : > { %s206_s6 = sshll.u32 %s205_s26, 4  ;;  %s50_s26 = sadd.s32 1, %s1115_s20  ;;  %s207_s6 = int_to_ptr.hbm [resolvable:$true] %s206_s6 }
  0x22   : > { %760 = dma.hbm_to_vmem [thread:$0]  (!%p758_p7), %s207_s6, 2048, %s209_s29, %s1274_s7, %s1510_s8, %s1138_s9, %s1139_s3  }
  0x23   : > { %s1288_s30 = scalar_select %p48_p5, %s1115_s20, %s50_s26  }
  0x24   : > { %s726_s10 = sshll.u32 %s1127_s23, 3  ;;  %p59_p13 = por %p58_p1, %p57_p11 }
  0x25   : > { %1526 = sst [smem:[#allocation16_spill]] %s1288_s30  ;;  %s638_s29 = sshll.u32 %s169_s5, 4 }
  0x26   : > { %s1527_s0 = sld [smem:[#allocation19_spill]]  ;;  %s173_s26 = scalar_lea.vmem [#allocation2], %s638_s29 }
  0x27   : > { %s184_s8 = sshll.u32 %s173_s26, 4  ;;  %p755_p2 = pnand %p768_p6, %p59_p13  ;;  %s185_s8 = int_to_ptr.vmem [resolvable:$true] %s184_s8 }
  0x28   : > { %s170_s1 = scalar_lea.sflag [#allocation3], %s169_s5  ;;  %s1140_s11 = smov 256  }
  0x29   : > { %s1528_s6 = smov 128   ;;  %s635_s29 = sadd.s32 4294967294, %s1135_s25  }
  0x2a   : > { %s1529_s26 = sadd.s32 1, %s1131_s24  ;;  %p111_p9 = scmp.ne.s32.totalorder %s1091_s14, %s1087_s13 }
  0x2b   : > { %s1561_s26 = smov (!%p1237_p0, %s1529_s26), %s1131_s24  ;;  %p117_p0 = scmp.ne.s32.totalorder %s1087_s13, %s1083_s12 }
  0x2c   : > { %s181_s9 = scalar_lea.hbm %s1527_s0, %s726_s10  ;;  %s1141_s10 = smov 8  }
  0x2d   : > { %s182_s3 = sshll.u32 %s181_s9, 4  ;;  %s1305_s9 = sadd.s32 4294967295, %s1135_s25   ;;  %s183_s3 = int_to_ptr.hbm [resolvable:$true] %s182_s3 }
  0x2e   : > { %757 = dma.hbm_to_vmem [thread:$0]  (!%p755_p2), %s183_s3, 256, %s185_s8, %s170_s1, %s1140_s11, %s1528_s6, %s1141_s10  }
  0x2f   : > { %p64_p3 = scmp.eq.s32.totalorder %s1305_s9, 0  ;;  %p39_p8 = scmp.ge.s32.totalorder %s1561_s26, 2 }
  0x30   : > { %s104_s8 = sadd.s32 1, %s1091_s14  ;;  %p1337_p11 = por %p111_p9, %p58_p1 }
  0x31   : > { %p1317_p5 = por %p64_p3, %p63_p12  ;;  %p1324_p7 = por %p91_p4, %p64_p3 }
  0x32   : > { %s1563_s26 = smov (%p39_p8, %s1561_s26), 0  ;;  %p1344_p4 = por %p117_p0, %p64_p3 }
  0x33   : > { %1532 = sst [smem:[#allocation17_spill]] %s1563_s26  ;;  %s74_s28 = ssub.s32 %s1131_s24, %s1563_s26 }
  0x34   : > { %p143_p12 = scmp.eq.s32.totalorder %s1305_s9, 3  ;;  %s75_s3 = sor.u32 %s74_s28, %s1259_s4 }
  0x35   : > { %p102_p13 = scmp.eq.s32.totalorder %s74_s28, 0  ;;  %p76_p2 = scmp.eq.s32.totalorder %s75_s3, 0 }
  0x36   : > { %p1352_p8 = por %p143_p12, %p111_p9  ;;  %s1537_s6 = sadd.s32 1, %s1103_s17 }
  0x37   : > { %s1357_s10 = scalar_select %p102_p13, %s1091_s14, %s104_s8  }
  0x38   : > { %s1535_s11 = scalar_select %p1352_p8, 1, 0 }
  0x39   : > { %s1362_s0 = scalar_select %p76_p2, %s1103_s17, %s1537_s6  }
  0x3a   : > { %1536 = sst [smem:[#allocation18_spill]] %s1535_s11  ;;  %p149_p1 = scmp.eq.s32.totalorder %s635_s29, 3 }
  0x3b   : > { %s220_s23 = sand.u32 1, %s1091_s14   ;;  %s224_s20 = scalar_lea.hbm %s1506_s2, %s1131_s24 }
  0x3c   : > { %p1372_p3 = por %p149_p1, %p117_p0  ;;  %s226_s28 = sshll.u32 %s224_s20, 4  ;;  %s227_s28 = int_to_ptr.hbm [resolvable:$true] %s226_s28 }
  0x3d   : > { %s221_s3 = scalar_lea.vmem [#allocation7], %s220_s23  ;;  %p761_p9 = pnand %p768_p6, %p1337_p11 }
  0x3e   : > { %s228_s11 = sshll.u32 %s221_s3, 4  ;;  %237 = sbr.rel (%p1280_p10) target bundleno = 261 (0x105), region = 32  ;;  %s229_s11 = int_to_ptr.vmem [resolvable:$true] %s228_s11 }
  0x3f   : > { %763 = dma.hbm_to_vmem [thread:$0]  (!%p761_p9), %s227_s28, 16, %s229_s11, %s1274_s7  }
  0x40   : > { %s239_s30 = sand.u32 (!%p1280_p10), 1, %s1111_s19  }
  0x41   : > { %s646_s29 = sshll.u32 (!%p1280_p10), %s239_s30, 4  ;;  %s240_s26 = scalar_lea.sflag (!%p1280_p10), [#allocation3], %s239_s30 }
  0x42   : > { %s1384_s8 = scalar_lea.vmem (!%p1280_p10), [#allocation2], %s646_s29 }
  0x43   : > { %1066 = dma.done.wait (%p1317_p5), %s240_s26, 256  }
  0x44   : > { %1068 = vsyncadd (%p1317_p5), %s240_s26, 4294967040  ;;  %s249_s20 = sand.u32 1, %s1305_s9   ;;  %s251_s23 = sand.u32 1, %s1099_s16  }
  0x45   : > { %s647_s7 = sshll.u32 %s251_s23, 7  ;;  %s250_s27 = scalar_lea.sflag [#allocation6], %s249_s20 }
  0x46   : > { %s1392_s15 = scalar_lea.vmem [#allocation5], %s647_s7 }
  0x47   : > { %1070 = dma.done.wait (%p1324_p7), %s250_s27, 2048  }
  0x48   : > { %1072 = vsyncadd (%p1324_p7), %s250_s27, 4294965248  ;;  %s1399_s11 = sand.u32 1, %s1087_s13  }
  0x49   : > { %s262_s5 = scalar_lea.vmem [#allocation7], %s1399_s11 }
  0x4a   : > { %1074 = dma.done.wait (%p1344_p4), %s250_s27, 16  }
  0x4b   : > { %1076 = vsyncadd (%p1344_p4), %s250_s27, 4294967280  ;;  %s648_s9 = sshll.u32 %s1399_s11, 4  ;;  %p649_p6 = scmp.ne.s32.totalorder %s1119_s21, 0 }
  0x4c   : > { %s1407_s6 = scalar_lea.vmem [#allocation8], %s648_s9 }
  0x4d   : > { %302 = sbr.rel (%p649_p6) target bundleno = 85 (0x55), region = 48 }
  0x52   : > { %v890_v0 = vld [vmem:[%s262_s5] ss:$0 sm:$0xff] }
  0x53   : > { %307 = vst [vmem:[%s1407_s6] sm:$0xff] %v890_v0 }
  0x54   : > { %308 = vst [vmem:[%s1407_s6 + $0x8] sm:$0xff] %v890_v0 }
  0x55 PF: > { %v737_v1 = vld [vmem:[%s1392_s15 + $0x38] sm:$0xff]  ;;  %v736_v3 = vld [vmem:[%s1392_s15 + $0x30] sm:$0xff]  ;;  %v735_v5 = vld [vmem:[%s1392_s15 + $0x28] sm:$0xff]  ;;  %s723_s21 = sshll.u32 %s1123_s22, 3  ;;  %s1539_s28 = sld [smem:[#allocation21_spill]] }
  0x56   : > { %v745_v2 = vld [vmem:[%s1392_s15 + $0x78] sm:$0xff]  ;;  %451 = vmatpush.bf16.msra.mxu0 %v737_v1  ;;  %v744_v4 = vld [vmem:[%s1392_s15 + $0x70] sm:$0xff]  ;;  %v743_v6 = vld [vmem:[%s1392_s15 + $0x68] sm:$0xff]  ;;  %s498_s29 = sshll.u32 %s1407_s6, 4  ;;  %s499_s29 = int_to_ptr.vmem [resolvable:$true] %s498_s29 }
  0x57   : > { %465 = vmatpush.bf16.msra.mxu1 %v745_v2  ;;  %v734_v7 = vld [vmem:[%s1392_s15 + $0x20] sm:$0xff]  ;;  %v733_v9 = vld [vmem:[%s1392_s15 + $0x18] sm:$0xff]  ;;  %v732_v11 = vld [vmem:[%s1392_s15 + $0x10] sm:$0xff] }
  0x58   : > { %v742_v8 = vld [vmem:[%s1392_s15 + $0x60] sm:$0xff]  ;;  %v741_v10 = vld [vmem:[%s1392_s15 + $0x58] sm:$0xff]  ;;  %v740_v12 = vld [vmem:[%s1392_s15 + $0x50] sm:$0xff] }
  0x59   : > { %v731_v13 = vld [vmem:[%s1392_s15 + $0x8] sm:$0xff]  ;;  %v730_v15 = vld [vmem:[%s1392_s15] sm:$0xff] }
  0x5a   : > { %452 = vmatpush.bf16.msra.mxu0 %v736_v3  ;;  %v739_v14 = vld [vmem:[%s1392_s15 + $0x48] sm:$0xff]  ;;  %v738_v16 = vld [vmem:[%s1392_s15 + $0x40] sm:$0xff] }
  0x5b   : > { %466 = vmatpush.bf16.msra.mxu1 %v744_v4  ;;  %v652_v17 = vld [vmem:[%s1384_s8] sm:$0xf]  ;;  %v729_v18 = vld [vmem:[%s1384_s8 + $0x4] sm:$0xf0]  ;;  %v728_v19 = vld [vmem:[%s1384_s8 + $0x4] sm:$0xf]  ;;  %s497_s3 = scalar_lea.hbm %s1539_s28, %s723_s21 }
  0x5c   : > { %v654_v20 = vld [vmem:[%s1384_s8 + $0x8] sm:$0xf0]  ;;  %v653_v21 = vor.u32 %v729_v18, %v652_v17  ;;  %v309_v24 = vld [vmem:[%s1407_s6] sm:$0xff]  ;;  %s500_s26 = sshll.u32 %s497_s3, 4  ;;  %s484_s8 = scalar_lea.sflag [#allocation4], %s1399_s11  ;;  %s501_s26 = int_to_ptr.hbm [resolvable:$true] %s500_s26 }
  0x5d   : > { %v657_v22 = vor.u32 %v728_v19, %v654_v20  ;;  %v310_v29 = vld [vmem:[%s1407_s6 + $0x8] sm:$0xff]  ;;  %s995_s20 = sshra.s32 %s501_s26, 4  ;;  %s1001_s27 = scalar_lea.hbm %s1539_s28, 32  ;;  %s996_s20 = int_to_ptr.hbm [resolvable:$true] %s995_s20 }
  0x5e   : > { %453 = vmatpush.bf16.msra.mxu0 %v735_v5  ;;  %s997_s22 = scalar_lea.hbm %s996_s20, 16  ;;  %p1002_p0 = scmp.lt.s32.totalorder %s996_s20, %s1539_s28 }
  0x5f   : > { %467 = vmatpush.bf16.msra.mxu1 %v743_v6  ;;  %p998_p10 = scmp.ne.s32.totalorder %s996_s20, %s997_s22  ;;  %p1003_p11 = scmp.lt.s32.totalorder %s1001_s27, %s997_s22 }
  0x61   : > { %p999_p5 = pnand %p998_p10, %p1352_p8  ;;  %p1004_p4 = por %p1003_p11, %p1002_p0 }
  0x62   : > { %454 = vmatpush.bf16.msra.mxu0 %v734_v7 }
  0x63   : > { %468 = vmatpush.bf16.msra.mxu1 %v742_v8  ;;  %p1000_p7 = pneg %p999_p5 }
  0x65   : > { %p1005_p12 = pnand %p1004_p4, %p1000_p7 }
  0x66   : > { %455 = vmatpush.bf16.msra.mxu0 %v733_v9 }
  0x67   : > { %469 = vmatpush.bf16.msra.mxu1 %v741_v10 }
  0x6a   : > { %456 = vmatpush.bf16.msra.mxu0 %v732_v11 }
  0x6b   : > { %470 = vmatpush.bf16.msra.mxu1 %v740_v12 }
  0x6e   : > { %457 = vmatpush.bf16.msra.mxu0 %v731_v13 }
  0x6f   : > { %471 = vmatpush.bf16.msra.mxu1 %v739_v14 }
  0x72   : > { %458 = vmatpush.bf16.msra.mxu0 %v730_v15 }
  0x73   : > { %472 = vmatpush.bf16.msra.mxu1 %v738_v16 }
  0x75   : > { %459 = vmatmul.bf16.vlgmr.msra.gmra.mxu0 %v653_v21 }
  0x76   : > { %473 = vmatmul.bf16.vlgmr.msra.gmra.mxu1 %v657_v22 }
  0xf2   : > { %v460_v23 = vpop.f32.mrf.mxu0 }
  0xf3   : > { %v474_v25 = vpop.f32.mrf.mxu1 }
  0xf4   : > { %v475_v26 = vadd.f32 %v474_v25, %v460_v23 }
  0xf6   : > { %v479_v27 = vadd.f32 %v475_v26, %v309_v24 }
  0xf8   : > { %481 = vst [vmem:[%s1407_s6] sm:$0xff] %v479_v27 }
  0xfa   : > { %v462_v28 = vpop.f32.mrf.mxu0 }
  0xfb   : > { %v476_v30 = vpop.f32.mrf.mxu1 }
  0xfc   : > { %v477_v31 = vadd.f32 %v476_v30, %v462_v28 }
  0xfe   : > { %v480_v32 = vadd.f32 %v477_v31, %v310_v29 }
 0x100   : > { %482 = vst [vmem:[%s1407_s6 + $0x8] sm:$0xff] %v480_v32 }
 0x101   : > { %1008 = shalt.err (!%p1005_p12)
}
 0x102   : > { %s1142_s11 = smov 128   ;;  %s1143_s9 = smov 256  }
 0x103   : > { %s1144_s6 = smov 8  }
 0x104   : > { %752 = dma.vmem_to_hbm [thread:$0]  (%p1352_p8), %s499_s29, 256, %s501_s26, %s484_s8, %s1142_s11, %s1143_s9, %s1144_s6  }
 0x105 PF: > { %p769_p13 = scmp.ge.s32.totalorder %s1135_s25, 2  ;;  %s515_s21 = sand.u32 1, %s1083_s12  }
 0x106   : > { %s516_s1 = scalar_lea.sflag [#allocation4], %s515_s21 }
 0x107   : > { %p765_p2 = pnand %p769_p13, %p1372_p3 }
 0x109   : > { %p766_p1 = pneg %p765_p2 }
 0x10b   : > { %1078 = dma.done.wait (%p766_p1), %s516_s1, 256  }
 0x10c   : > { %1080 = vsyncadd (%p766_p1), %s516_s1, 4294967040  ;;  %s22_s25 = sadd.s32 1, %s1135_s25   ;;  %s1542_s3 = sld [smem:[#allocation13_spill]] }
 0x10d   : > { %p1457_p9 = scmp.ge.s32.totalorder %s22_s25, 6   ;;  %s1543_s20 = sld [smem:[#allocation16_spill]] }
 0x10e   : > { %s1544_s21 = sld [smem:[#allocation14_spill]]  ;;  %s1548_s12 = smov %s1087_s13 }
 0x10f   : > { %s1545_s23 = sld [smem:[#allocation15_spill]]  ;;  %s1549_s13 = smov %s1091_s14 }
 0x110   : > { %s1546_s4 = sld [smem:[#allocation17_spill]]  ;;  %s1550_s14 = smov %s1357_s10 }
 0x111   : > { %s1551_s15 = smov %s1099_s16  ;;  %s1552_s16 = smov %s1103_s17 }
 0x112   : > { %s1553_s17 = smov %s1362_s0  ;;  %s1554_s18 = smov %s1111_s19 }
 0x113   : > { %s1555_s19 = smov %s1542_s3  ;;  %s1556_s22 = smov %s1131_s24 }
 0x114   :  { %21 = sbr.rel (!%p1457_p9) target bundleno = 16 (0x10), region = 105 }
 0x116   : > { %s1557_s24 = smov %s1546_s4 }
 0x119   :  { %522 = vsyncpa [#allocation3], 1 }
 0x11a   :  { %524 = vsyncpa [#allocation3 + $0x1], 1 }
 0x11b   :  { %525 = vsyncpa [#allocation6], 1 }
 0x11c   :  { %527 = vsyncpa [#allocation6 + $0x1], 1 }
 0x11d   :  { %528 = vsyncpa [#allocation4], 1 }
 0x11e   :  { %530 = vsyncpa [#allocation4 + $0x1], 1 }

</bundles_post_ra>
